<compile_context>
chip_gen: v7x
topology: tpu7x:2x2x1
jax: 0.10.0
libtpu: 0.0.40
codegen_flags: <defaults>
</compile_context>

<pallas_src>
import functools

import jax
import jax.numpy as jnp
from jax.experimental import pallas as pl
from jax.experimental.pallas import tpu as pltpu

_COMPUTE_DTYPE = jnp.bfloat16

# tap order used when packing the (9*Cin, Cout) weight; must match the kernel's group table.
_TAP_ORDER = ((0, 0), (0, 1), (1, 0), (1, 1), (2, 0), (2, 1), (0, 2), (1, 2), (2, 2))


def _conv3x3_s2_kernel(xp_ref, w_ref, b_ref, o_ref, *, hout, wout, cin, apply_relu):
    """3x3 / stride-2 / pad-1 conv for one batch element, phase-decomposed input.

    xp_ref: (1, hout+1, wout+1, 4*cin)  zero-padded phase-concat input (bf16);
            channel block (2*a + b) holds x_pad[2i+a, 2j+b, :].
    w_ref : (9*cin, cout)               weight packed in _TAP_ORDER
    b_ref : (1, cout)                   f32 bias
    o_ref : (1, hout*wout, cout)        lane-dense output slab
    """
    xp = xp_ref[0]                                   # (hq, wq, 4*cin)
    if apply_relu:                                   # fused ReLU on the (decimated) conv input
        xp = jnp.maximum(xp, 0)

    rows = hout * wout

    # (dh, dw, xp channel offset, contraction width K, packed-weight row offset)
    # tap (kh, kw) -> phase (kh%2, kw%2), offset (kh//2, kw//2)
    groups = (
        (0, 0, 0 * cin, 4 * cin, 0 * cin),   # taps (0,0) (0,1) (1,0) (1,1)   one K=4C matmul
        (1, 0, 0 * cin, 2 * cin, 4 * cin),   # taps (2,0) (2,1)               one K=2C matmul
        (0, 1, 0 * cin, 1 * cin, 6 * cin),   # tap  (0,2)
        (0, 1, 2 * cin, 1 * cin, 7 * cin),   # tap  (1,2)
        (1, 1, 0 * cin, 1 * cin, 8 * cin),   # tap  (2,2)
    )

    acc = None
    for dh, dw, c0, k, w0 in groups:
        lhs = xp[dh:dh + hout, dw:dw + wout, c0:c0 + k].reshape(rows, k)
        d = jnp.dot(lhs, w_ref[w0:w0 + k, :], preferred_element_type=jnp.float32)
        acc = d if acc is None else acc + d

    o_ref[0] = (acc + b_ref[...]).astype(o_ref.dtype)


def _pack_weight(w_oihw, compute_dtype=_COMPUTE_DTYPE):
    """(Cout, Cin, 3, 3) OIHW -> (9*Cin, Cout) packed along the contraction dim in _TAP_ORDER."""
    w_hwio = jnp.transpose(w_oihw, (2, 3, 1, 0))          # (3, 3, Cin, Cout)
    return jnp.concatenate([w_hwio[kh, kw] for kh, kw in _TAP_ORDER],
                           axis=0).astype(compute_dtype)  # (9*Cin, Cout)


def _phase_concat(x_nhwc, hout, wout, compute_dtype=_COMPUTE_DTYPE):
    """Zero-pad + 2x2 space-to-depth: (B, H, W, C) -> (B, hout+1, wout+1, 4*C)."""
    B, H, W, C = x_nhwc.shape
    hq, wq = hout + 1, wout + 1
    xpad = jnp.pad(x_nhwc, ((0, 0), (1, 2 * hq - 1 - H), (1, 2 * wq - 1 - W), (0, 0)))
    phases = [xpad[:, a::2, b::2, :] for a in (0, 1) for b in (0, 1)]   # each (B, hq, wq, C)
    return jnp.concatenate(phases, axis=-1).astype(compute_dtype)       # (B, hq, wq, 4*C)


def _conv3x3_s2_nhwc(x_nhwc, w_packed, bias, *, apply_relu=False):
    """Conv2d(k=3, s=2, p=1) on NHWC input -> NHWC f32 output; all conv math in Pallas."""
    B, H, W, Cin = x_nhwc.shape
    Cout = w_packed.shape[-1]
    hout, wout = (H + 1) // 2, (W + 1) // 2
    rows = hout * wout
    hq, wq = hout + 1, wout + 1

    xp = _phase_concat(x_nhwc, hout, wout, w_packed.dtype)
    b2 = bias.reshape(1, Cout).astype(jnp.float32)

    cbytes = jnp.dtype(w_packed.dtype).itemsize
    est = (2 * hq * wq * 4 * Cin * cbytes          # double-buffered input block
           + 2 * rows * Cout * 4                   # double-buffered output block
           + 2 * 9 * Cin * Cout * cbytes           # weight (worst-case double buffered)
           + 2 * Cout * 4
           + rows * (4 * Cin * cbytes + 4 * Cout))  # in-kernel operand / accumulator temps
    vmem_limit = int(min(max(2 * est, 32 * 1024 * 1024), 100 * 1024 * 1024))

    kernel = functools.partial(_conv3x3_s2_kernel, hout=hout, wout=wout,
                               cin=Cin, apply_relu=apply_relu)

    out = pl.pallas_call(
        kernel,
        out_shape=jax.ShapeDtypeStruct((B, rows, Cout), jnp.float32),
        grid=(B,),
        in_specs=[
            pl.BlockSpec((1, hq, wq, 4 * Cin), lambda b: (b, 0, 0, 0)),
            pl.BlockSpec((9 * Cin, Cout), lambda b: (0, 0)),   # constant block: DMA'd once
            pl.BlockSpec((1, Cout), lambda b: (0, 0)),
        ],
        out_specs=pl.BlockSpec((1, rows, Cout), lambda b: (b, 0, 0)),
        compiler_params=pltpu.CompilerParams(
            dimension_semantics=("parallel",),
            vmem_limit_bytes=vmem_limit,
        ),
    )(xp, w_packed, b2)

    return out.reshape(B, hout, wout, Cout)


def conv3x3_s2_pallas(x_nchw, w_oihw, bias, *, apply_relu_to_input=False):
    """Conv2d(kernel=3, stride=2, padding=1), NCHW in / NCHW out (PyTorch convention)."""
    x_nhwc = jnp.transpose(x_nchw, (0, 2, 3, 1))
    y = _conv3x3_s2_nhwc(x_nhwc, _pack_weight(w_oihw), bias, apply_relu=apply_relu_to_input)
    return jnp.transpose(y, (0, 3, 1, 2)).astype(x_nchw.dtype)


class LastLevelP6P7:
    """JAX/Pallas port of the torchvision / MLPerf-RetinaNet LastLevelP6P7 block."""

    def __init__(self, in_channels, out_channels, key):
        k6, k7 = jax.random.split(key)
        # kaiming_uniform_(a=1): bound = sqrt(6 / ((1 + a^2) * fan_in)) = sqrt(3 / fan_in)
        fan_in6 = in_channels * 9
        bound6 = (3.0 / fan_in6) ** 0.5
        self.w6 = jax.random.uniform(
            k6, (out_channels, in_channels, 3, 3), jnp.float32, -bound6, bound6)
        self.b6 = jnp.zeros((out_channels,), jnp.float32)

        fan_in7 = out_channels * 9
        bound7 = (3.0 / fan_in7) ** 0.5
        self.w7 = jax.random.uniform(
            k7, (out_channels, out_channels, 3, 3), jnp.float32, -bound7, bound7)
        self.b7 = jnp.zeros((out_channels,), jnp.float32)

        # pre-packed bf16 weights in the kernel's contraction layout
        self.w6p = _pack_weight(self.w6)
        self.w7p = _pack_weight(self.w7)

        self.use_P5 = in_channels == out_channels
        # TODO(synk): mllogger WEIGHTS_INITIALIZATION events are logging side effects; omitted.

    def __call__(self, p, c, names):
        p5, c5 = p[-1], c[-1]
        x = p5 if self.use_P5 else c5
        x_nhwc = jnp.transpose(x, (0, 2, 3, 1))
        # p6 feeds the p7 conv directly in NHWC form (no NCHW round trip / HBM re-pad);
        # the ReLU in front of the p7 conv is fused into the p7 kernel.
        p6_nhwc = _conv3x3_s2_nhwc(x_nhwc, self.w6p, self.b6, apply_relu=False)
        p7_nhwc = _conv3x3_s2_nhwc(p6_nhwc, self.w7p, self.b7, apply_relu=True)
        p6 = jnp.transpose(p6_nhwc, (0, 3, 1, 2)).astype(x.dtype)
        p7 = jnp.transpose(p7_nhwc, (0, 3, 1, 2)).astype(x.dtype)
        return list(p) + [p6, p7], list(names) + ["p6", "p7"]


def _ref_conv(x, w, b):
    # reference with the same numerics as the kernel: bf16 operands, f32 accumulation/bias
    y = jax.lax.conv_general_dilated(
        x.astype(_COMPUTE_DTYPE), w.astype(_COMPUTE_DTYPE),
        window_strides=(2, 2), padding=((1, 1), (1, 1)),
        dimension_numbers=("NCHW", "OIHW", "NCHW"),
        preferred_element_type=jnp.float32)
    return y + b.reshape(1, -1, 1, 1)


if __name__ == "__main__":
    key = jax.random.PRNGKey(0)
    kp, kc, kw = jax.random.split(key, 3)

    B, C, H, W = 2, 4, 16, 16          # in_channels == out_channels -> use_P5 = True
    p5 = jax.random.normal(kp, (B, C, H, W), jnp.float32)
    c5 = jax.random.normal(kc, (B, C, H, W), jnp.float32)

    block = LastLevelP6P7(in_channels=C, out_channels=C, key=kw)

    p_list, names = block([p5], [c5], ["p5"])
    p6, p7 = p_list[-2], p_list[-1]
    jax.block_until_ready(p7)

    assert p6.shape == (B, C, H // 2, W // 2)
    assert p7.shape == (B, C, H // 4, W // 4)
    assert names == ["p5", "p6", "p7"]

    # reference check against XLA conv (matching bf16 x bf16 -> f32 numerics)
    r6 = _ref_conv(p5, block.w6, block.b6)
    r7 = _ref_conv(jax.nn.relu(r6), block.w7, block.b7)
    assert jnp.allclose(p6, r6, atol=1e-2, rtol=1e-2), float(jnp.max(jnp.abs(p6 - r6)))
    assert jnp.allclose(p7, r7, atol=1e-2, rtol=1e-2), float(jnp.max(jnp.abs(p7 - r7)))

    # odd spatial sizes (real RetinaNet P5/P6 maps, e.g. 25x25 -> 13x13) are supported
    x_odd = jax.random.normal(kp, (1, C, 15, 15), jnp.float32)
    y_odd = conv3x3_s2_pallas(x_odd, block.w6, block.b6)
    jax.block_until_ready(y_odd)
    assert y_odd.shape == (1, C, 8, 8)
    r_odd = _ref_conv(x_odd, block.w6, block.b6)
    assert jnp.allclose(y_odd, r_odd, atol=1e-2, rtol=1e-2)

    print("KERNEL_OK")
</pallas_src>

<mosaic_0001>
module attributes {stable_mosaic.version = 11 : i64} {
  func.func @_conv3x3_s2_kernel(%arg0: i32, %arg1: memref<1x9x9x16xbf16, #tpu.memory_space<vmem>>, %arg2: memref<36x4xbf16, #tpu.memory_space<vmem>>, %arg3: memref<1x4xf32, #tpu.memory_space<vmem>>, %arg4: memref<1x64x4xf32, #tpu.memory_space<vmem>>) attributes {dimension_semantics = [#tpu.dimension_semantics<parallel>], iteration_bounds = array<i64: 2>, scalar_prefetch = 0 : i64, scratch_operands = 0 : i64, tpu.core_type = #tpu.core_type<tc>, window_params = [{transform_indices = @transform_0, window_bounds = array<i64: 1, 9, 9, 16>}, {pipeline_mode = #tpu.pipeline_mode<synchronous>, transform_indices = @transform_1, window_bounds = array<i64: 36, 4>}, {pipeline_mode = #tpu.pipeline_mode<synchronous>, transform_indices = @transform_2, window_bounds = array<i64: 1, 4>}, {transform_indices = @transform_3, window_bounds = array<i64: 1, 64, 4>}]} {
    %c0 = arith.constant 0 : index
    %c0_0 = arith.constant 0 : index
    %c0_1 = arith.constant 0 : index
    %c0_2 = arith.constant 0 : index
    %0 = vector.load %arg1[%c0, %c0_0, %c0_1, %c0_2] : memref<1x9x9x16xbf16, #tpu.memory_space<vmem>>, vector<1x9x9x16xbf16>
    %1 = vector.shape_cast %0 : vector<1x9x9x16xbf16> to vector<9x9x16xbf16>
    %2 = vector.extract_strided_slice %1 {offsets = [0, 0, 0], sizes = [8, 8, 16], strides = [1, 1, 1]} : vector<9x9x16xbf16> to vector<8x8x16xbf16>
    %3 = vector.shape_cast %2 : vector<8x8x16xbf16> to vector<64x16xbf16>
    %c0_3 = arith.constant 0 : index
    %c0_4 = arith.constant 0 : index
    %4 = vector.load %arg2[%c0_3, %c0_4] : memref<36x4xbf16, #tpu.memory_space<vmem>>, vector<16x4xbf16>
    %cst = arith.constant dense<0.000000e+00> : vector<64x4xf32>
    %5 = tpu.matmul %3, %4, %cst {dimension_numbers = #tpu.dot_dimension_numbers<[1], [0], [0], [1], [0, 0, 1, 1], [], []>} : vector<64x16xbf16>, vector<16x4xbf16>, vector<64x4xf32> -> vector<64x4xf32>
    %6 = vector.extract_strided_slice %1 {offsets = [1, 0, 0], sizes = [8, 8, 8], strides = [1, 1, 1]} : vector<9x9x16xbf16> to vector<8x8x8xbf16>
    %7 = vector.shape_cast %6 : vector<8x8x8xbf16> to vector<64x8xbf16>
    %c16 = arith.constant 16 : index
    %c0_5 = arith.constant 0 : index
    %8 = vector.load %arg2[%c16, %c0_5] : memref<36x4xbf16, #tpu.memory_space<vmem>>, vector<8x4xbf16>
    %cst_6 = arith.constant dense<0.000000e+00> : vector<64x4xf32>
    %9 = tpu.matmul %7, %8, %cst_6 {dimension_numbers = #tpu.dot_dimension_numbers<[1], [0], [0], [1], [0, 0, 1, 1], [], []>} : vector<64x8xbf16>, vector<8x4xbf16>, vector<64x4xf32> -> vector<64x4xf32>
    %10 = arith.addf %5, %9 : vector<64x4xf32>
    %11 = vector.extract_strided_slice %1 {offsets = [0, 1, 0], sizes = [8, 8, 4], strides = [1, 1, 1]} : vector<9x9x16xbf16> to vector<8x8x4xbf16>
    %12 = vector.shape_cast %11 : vector<8x8x4xbf16> to vector<64x4xbf16>
    %c24 = arith.constant 24 : index
    %c0_7 = arith.constant 0 : index
    %13 = vector.load %arg2[%c24, %c0_7] : memref<36x4xbf16, #tpu.memory_space<vmem>>, vector<4x4xbf16>
    %cst_8 = arith.constant dense<0.000000e+00> : vector<64x4xf32>
    %14 = tpu.matmul %12, %13, %cst_8 {dimension_numbers = #tpu.dot_dimension_numbers<[1], [0], [0], [1], [0, 0, 1, 1], [], []>} : vector<64x4xbf16>, vector<4x4xbf16>, vector<64x4xf32> -> vector<64x4xf32>
    %15 = arith.addf %10, %14 : vector<64x4xf32>
    %16 = vector.extract_strided_slice %1 {offsets = [0, 1, 8], sizes = [8, 8, 4], strides = [1, 1, 1]} : vector<9x9x16xbf16> to vector<8x8x4xbf16>
    %17 = vector.shape_cast %16 : vector<8x8x4xbf16> to vector<64x4xbf16>
    %c28 = arith.constant 28 : index
    %c0_9 = arith.constant 0 : index
    %18 = vector.load %arg2[%c28, %c0_9] : memref<36x4xbf16, #tpu.memory_space<vmem>>, vector<4x4xbf16>
    %cst_10 = arith.constant dense<0.000000e+00> : vector<64x4xf32>
    %19 = tpu.matmul %17, %18, %cst_10 {dimension_numbers = #tpu.dot_dimension_numbers<[1], [0], [0], [1], [0, 0, 1, 1], [], []>} : vector<64x4xbf16>, vector<4x4xbf16>, vector<64x4xf32> -> vector<64x4xf32>
    %20 = arith.addf %15, %19 : vector<64x4xf32>
    %21 = vector.extract_strided_slice %1 {offsets = [1, 1, 0], sizes = [8, 8, 4], strides = [1, 1, 1]} : vector<9x9x16xbf16> to vector<8x8x4xbf16>
    %22 = vector.shape_cast %21 : vector<8x8x4xbf16> to vector<64x4xbf16>
    %c32 = arith.constant 32 : index
    %c0_11 = arith.constant 0 : index
    %23 = vector.load %arg2[%c32, %c0_11] : memref<36x4xbf16, #tpu.memory_space<vmem>>, vector<4x4xbf16>
    %cst_12 = arith.constant dense<0.000000e+00> : vector<64x4xf32>
    %24 = tpu.matmul %22, %23, %cst_12 {dimension_numbers = #tpu.dot_dimension_numbers<[1], [0], [0], [1], [0, 0, 1, 1], [], []>} : vector<64x4xbf16>, vector<4x4xbf16>, vector<64x4xf32> -> vector<64x4xf32>
    %25 = arith.addf %20, %24 : vector<64x4xf32>
    %c0_13 = arith.constant 0 : index
    %c0_14 = arith.constant 0 : index
    %26 = vector.load %arg3[%c0_13, %c0_14] : memref<1x4xf32, #tpu.memory_space<vmem>>, vector<1x4xf32>
    %27 = vector.broadcast %26 : vector<1x4xf32> to vector<64x4xf32>
    %28 = arith.addf %25, %27 : vector<64x4xf32>
    %c0_15 = arith.constant 0 : index
    %c0_16 = arith.constant 0 : index
    %c0_17 = arith.constant 0 : index
    %29 = vector.load %arg4[%c0_15, %c0_16, %c0_17] : memref<1x64x4xf32, #tpu.memory_space<vmem>>, vector<1x64x4xf32>
    %30 = vector.shape_cast %29 : vector<1x64x4xf32> to vector<64x4xf32>
    %31 = vector.shape_cast %28 : vector<64x4xf32> to vector<1x64x4xf32>
    tpu.vector_store %arg4[%c0_15, %c0_16, %c0_17], %31 {strides = array<i32>} : memref<1x64x4xf32, #tpu.memory_space<vmem>>, vector<1x64x4xf32>,
    return
  }
  func.func @transform_0(%arg0: i32) -> (i32, i32, i32, i32) {
    %c0_i32 = arith.constant 0 : i32
    %c0_i32_0 = arith.constant 0 : i32
    %c0_i32_1 = arith.constant 0 : i32
    %c0_i32_2 = arith.constant 0 : i32
    return %arg0, %c0_i32, %c0_i32_0, %c0_i32_1 : i32, i32, i32, i32
  }
  func.func @transform_1(%arg0: i32) -> (i32, i32) {
    %c0_i32 = arith.constant 0 : i32
    %c0_i32_0 = arith.constant 0 : i32
    %c0_i32_1 = arith.constant 0 : i32
    return %c0_i32, %c0_i32_0 : i32, i32
  }
  func.func @transform_2(%arg0: i32) -> (i32, i32) {
    %c0_i32 = arith.constant 0 : i32
    %c0_i32_0 = arith.constant 0 : i32
    %c0_i32_1 = arith.constant 0 : i32
    return %c0_i32, %c0_i32_0 : i32, i32
  }
  func.func @transform_3(%arg0: i32) -> (i32, i32, i32) {
    %c0_i32 = arith.constant 0 : i32
    %c0_i32_0 = arith.constant 0 : i32
    %c0_i32_1 = arith.constant 0 : i32
    return %arg0, %c0_i32, %c0_i32_0 : i32, i32, i32
  }
}

</mosaic_0001>

<bundles_post_ra>
// kernel: tpu_custom_call.1
= control target key start
LH: loop header
LB: loop body
LE: loop exit
PB: predicated region body
PF: predicated region fallthrough
CT: control target
= control target key end

     0   :  { %s1103_s12 = smov 0   ;;  %s1307_s0 = inlined_call_operand.vmem [shape: bf16[2,9,9,16], index: 0, kind: input, shape index: {}]   ;;  %s1308_s1 = inlined_call_operand.vmem [shape: bf16[36,4], index: 1, kind: input, shape index: {}]   ;;  %s1309_s2 = inlined_call_operand.vmem [shape: f32[1,4], index: 2, kind: input, shape index: {}]   ;;  %s1310_s3 = inlined_call_operand.vmem [shape: f32[2,64,4], index: 3, kind: output, shape index: {}]  }
   0x1 LB: > { %s890_s13 = sadd.s32 4294967295, %s1080_s12   ;;  %p894_p0 = scmp.ge.s32.totalorder %s1080_s12, 1  ;;  %s1080_s12 = sphi %s1103_s12, %s13_s12  }
   0x2   : > { %p137_p1 = scmp.lt.s32.totalorder %s1080_s12, 3 }
   0x4   : > { %p138_p2 = pnand %p894_p0, %p137_p1 }
   0x5   : > { %p161_p3 = scmp.lt.s32.totalorder (!%p138_p2), %s890_s13, 1  ;;  %v192_v0 = vld [vmem:[%s1308_s1 + $0x8] sm:$0xf] (!%p138_p2)  ;;  %vm226_vm0 = vcmask (!%p138_p2), 1043456   ;;  %v1119_v2 = vld [vmem:[%s1308_s1] sm:$0xff] (!%p138_p2)   ;;  %vm526_vm1 = vcmask (!%p138_p2), 1041408  }
   0x6   : > { %141 = sbr.rel (%p138_p2) target bundleno = 396 (0x18c), region = 32  ;;  %1049 = vmatprep.subr.msk.bf16.mxu1 (!%p138_p2), %vm226_vm0, %v192_v0  ;;  %v228_v1 = vsel (!%p138_p2), %vm226_vm0, %v192_v0, 0  ;;  %v1124_v3 = vld [vmem:[%s1308_s1 + $0xc] sm:$0x3] (!%p138_p2)  ;;  %vm385_vm2 = vsmask.f32 (!%p138_p2), 3328 }
   0x7   : > { %966 = vmatpush3.bf16.msra.mxu1 (!%p138_p2), %v228_v1  ;;  %1050 = vmatprep.subr.msk.bf16.mxu0 (!%p138_p2), %vm526_vm1, %v1124_v3  ;;  %v1132_v4 = vsel (!%p138_p2), %vm526_vm1, %v1124_v3, 0  ;;  %v1137_v5 = vld [vmem:[%s1308_s1 + $0xc] ss:$0 sps:$4 sm:$0xcc] (!%p138_p2)   ;;  %vm386_vm3 = vsmask.f32 (!%p138_p2), 7440 }
   0x8   : > { %975 = vmatprep.subr.bf16.mxu1 (!%p138_p2), %v1119_v2  ;;  %986 = vmatpush3.bf16.msra.mxu0 (!%p138_p2), %v1132_v4  ;;  %v615_v6 = vrot.slane (!%p138_p2), %v1137_v5, 2  ;;  %vm513_vm4 = vcmask (!%p138_p2), 31744   ;;  %vm1178_vm5 = vmor (!%p138_p2), %vm385_vm2, %vm386_vm3  ;;  %vm213_vm6 = vcmask (!%p138_p2), 64512   ;;  %s1082_s26 = smov (!%p138_p2), 120   ;;  %vm307_vm7 = vcmask (!%p138_p2), 130048  }
   0xa   : > { %1052 = vmatprep.subr.msk.bf16.mxu0 (!%p138_p2), %vm526_vm1, %v615_v6 }
   0xd   : > { %s1314_s13 = smov (!%p161_p3, %s890_s13), 1 }
   0xe   : > { %s1054_s20 = smul.u32 72, %s1314_s13  ;;  %s939_s29 = sshll.u32 %s1314_s13, 6 }
   0xf   : > { %s170_s7 = scalar_lea.vmem %s1310_s3, %s939_s29 }
  0x10   : > { %s1143_s25 = scalar_lea.vmem %s1307_s0, %s1054_s20 }
  0x11   : > { %v1147_v7 = vld [vmem:[%s1143_s25] sm:$0xf]  ;;  %v173_v8 = vld [vmem:[%s1143_s25 + $0x4] sm:$0x1]  ;;  %v1151_v9 = vld [vmem:[%s1143_s25 + $0x8] sm:$0xf] }
  0x12   : > { %v175_v10 = vld [vmem:[%s1143_s25 + $0xc] sm:$0x1]  ;;  %v1155_v11 = vld [vmem:[%s1143_s25 + $0x10] sm:$0xf]  ;;  %v177_v12 = vld [vmem:[%s1143_s25 + $0x14] sm:$0x1] }
  0x13   : > { %v389_v13 = vshrl.u32 %v1147_v7, 16  ;;  %v392_v14 = vshll.u32 %v1147_v7, 16  ;;  %v398_v15 = vshll.u32 %v173_v8, 16  ;;  %v403_v16 = vshrl.u32 %v1151_v9, 16  ;;  %v1165_v17 = vld [vmem:[%s1143_s25 + $0x18] sm:$0xf] }
  0x14   : > { %v406_v18 = vshll.u32 %v1151_v9, 16  ;;  %v412_v19 = vshll.u32 %v175_v10, 16  ;;  %v417_v20 = vshrl.u32 %v1155_v11, 16  ;;  %v420_v21 = vshll.u32 %v1155_v11, 16  ;;  %v179_v22 = vld [vmem:[%s1143_s25 + $0x1c] sm:$0x1] }
  0x15   : > { %v391_v23 = vrot.slane %v389_v13, 4  ;;  %v394_v24 = vrot.slane %v392_v14, 5  ;;  %v400_v25 = vrot.slane %v398_v15, 5  ;;  %v405_v26 = vrot.slane %v403_v16, 4  ;;  %v1172_v27 = vld [vmem:[%s1143_s25 + $0x20] sm:$0xf] }
  0x16   : > { %v408_v28 = vrot.slane %v406_v18, 5  ;;  %v414_v29 = vrot.slane %v412_v19, 5  ;;  %v419_v30 = vrot.slane %v417_v20, 4  ;;  %v422_v31 = vrot.slane %v420_v21, 5  ;;  %v181_v40 = vld [vmem:[%s1143_s25 + $0x24] sm:$0x1] }
  0x17   : > { %v395_v32 = vor.u32 %v394_v24, %v391_v23  ;;  %v426_v33 = vshll.u32 %v177_v12, 16  ;;  %v431_v34 = vshrl.u32 %v1165_v17, 16  ;;  %v434_v35 = vshll.u32 %v1165_v17, 16  ;;  %v1185_v46 = vld [vmem:[%s1143_s25 + $0x28] sm:$0xf] }
  0x18   : > { %v409_v37 = vor.u32 %v408_v28, %v405_v26  ;;  %v423_v38 = vor.u32 %v422_v31, %v419_v30  ;;  %v440_v39 = vshll.u32 %v179_v22, 16  ;;  %v445_v41 = vshrl.u32 %v1172_v27, 16  ;;  %v183_v53 = vld [vmem:[%s1143_s25 + $0x2c] sm:$0x1]  ;;  %v1200_v58 = vld [vmem:[%s1143_s25 + $0x30] sm:$0xf] }
  0x19   : > { %v396_v42 = vrot.slane %v395_v32, 4  ;;  %v428_v43 = vrot.slane %v426_v33, 5  ;;  %v433_v44 = vrot.slane %v431_v34, 4  ;;  %v436_v45 = vrot.slane %v434_v35, 5  ;;  %v185_v0 = vld [vmem:[%s1143_s25 + $0x34] sm:$0x1] }
  0x1a   : > { %v410_v47 = vrot.slane %v409_v37, 4  ;;  %v424_v48 = vrot.slane %v423_v38, 4  ;;  %v442_v49 = vrot.slane %v440_v39, 5  ;;  %v447_v50 = vrot.slane %v445_v41, 4  ;;  %v1209_v14 = vld [vmem:[%s1143_s25 + $0x38] sm:$0xf] }
  0x1b   : > { %v401_v51 = vsel %vm1178_vm5, %v396_v42, %v400_v25  ;;  %v437_v52 = vor.u32 %v436_v45, %v433_v44  ;;  %v448_v54 = vshll.u32 %v1172_v27, 16  ;;  %v454_v55 = vshll.u32 %v181_v40, 16  ;;  %v187_v20 = vld [vmem:[%s1143_s25 + $0x3c] sm:$0x1]  ;;  %v188_v32 = vld [vmem:[%s1143_s25 + $0x40] sm:$0xf] }
  0x1c   : > { %v1193_v56 = vsel %vm1178_vm5, %v410_v47, %v414_v29  ;;  %v1197_v57 = vsel %vm1178_vm5, %v424_v48, %v428_v43  ;;  %v459_v59 = vshrl.u32 %v1185_v46, 16  ;;  %v462_v60 = vshll.u32 %v1185_v46, 16  ;;  %v189_v38 = vld [vmem:[%s1143_s25 + $0x44] sm:$0x1] }
  0x1d   : > { %v915_v61 = vcombine.low %v401_v51, %v1193_v56  ;;  %v928_v62 = vcombine.low %v1193_v56, %v1197_v57  ;;  %v438_v63 = vrot.slane %v437_v52, 4  ;;  %v450_v1 = vrot.slane %v448_v54, 5  ;;  %v936_v56 = vld [vmem:[%s1309_s2] ss:$0 sm:$0xff] }
  0x1e   : > { %v456_v8 = vrot.slane %v454_v55, 5  ;;  %v461_v10 = vrot.slane %v459_v59, 4  ;;  %v464_v12 = vrot.slane %v462_v60, 5  ;;  %v468_v13 = vshll.u32 %v183_v53, 16  ;;  %v718_v60 = vld [vmem:[%s1308_s1 + $0x10] sm:$0x3] }
  0x1f   : > { %604 = vrot.lane.b32.xlu0 %v915_v61, %s1082_s26  ;;  %v1214_v15 = vsel %vm1178_vm5, %v438_v63, %v442_v49  ;;  %v451_v16 = vor.u32 %v450_v1, %v447_v50  ;;  %v473_v18 = vshrl.u32 %v1200_v58, 16  ;;  %v476_v19 = vshll.u32 %v1200_v58, 16  ;;  %987 = vmatprep.mubr.msk.bf16.mxu0 %vm513_vm4, %v915_v61 }
  0x20   : > { %v916_v21 = vcombine.low %v1197_v57, %v1214_v15  ;;  %v465_v22 = vor.u32 %v464_v12, %v461_v10  ;;  %v470_v23 = vrot.slane %v468_v13, 5  ;;  %v482_v24 = vshll.u32 %v185_v0, 16 }
  0x21   : > { %v452_v25 = vrot.slane %v451_v16, 4  ;;  %v475_v26 = vrot.slane %v473_v18, 4  ;;  %v478_v28 = vrot.slane %v476_v19, 5  ;;  %v487_v29 = vshrl.u32 %v1209_v14, 16 }
  0x22   : > { %v466_v30 = vrot.slane %v465_v22, 4  ;;  %v484_v31 = vrot.slane %v482_v24, 5  ;;  %v490_v33 = vshll.u32 %v1209_v14, 16  ;;  %v496_v34 = vshll.u32 %v187_v20, 16  ;;  %988 = vmatmul.mubr.msk.bf16.vlgmr.msra.gmra.mrb[0].mxu0 %vm513_vm4, %v916_v21 }
  0x23   : > { %606 = vrot.lane.b32.xlu0 %v916_v21, %s1082_s26  ;;  %v1229_v35 = vsel %vm1178_vm5, %v452_v25, %v456_v8  ;;  %v479_v37 = vor.u32 %v478_v28, %v475_v26  ;;  %v489_v39 = vrot.slane %v487_v29, 4  ;;  %v705_v40 = vshrl.u32 %v188_v32, 16 }
  0x24   : > { %v471_v41 = vsel %vm1178_vm5, %v466_v30, %v470_v23  ;;  %v929_v42 = vcombine.low %v1214_v15, %v1229_v35  ;;  %v492_v43 = vrot.slane %v490_v33, 5  ;;  %v498_v44 = vrot.slane %v496_v34, 5 }
  0x25   : > { %v480_v45 = vrot.slane %v479_v37, 4  ;;  %v917_v47 = vcombine.low %v1229_v35, %v471_v41  ;;  %v707_v48 = vrot.slane %v705_v40, 4  ;;  %v708_v49 = vshll.u32 %v188_v32, 16 }
  0x26   : > { %v493_v50 = vor.u32 %v492_v43, %v489_v39  ;;  %v714_v51 = vshll.u32 %v189_v38, 16  ;;  %v898_v52 = vcombine.low %v1151_v9, %v1155_v11  ;;  %v899_v53 = vcombine.low %v1165_v17, %v1172_v27 }
  0x27   : > { %v485_v54 = vsel %vm1178_vm5, %v480_v45, %v484_v31  ;;  %608 = vrot.lane.b32.xlu1 %v917_v47, %s1082_s26  ;;  %v710_v55 = vrot.slane %v708_v49, 5  ;;  %v900_v59 = vcombine.low %v1185_v46, %v1200_v58  ;;  %v629_v8 = vsel %vm526_vm1, %v615_v6, 0 }
  0x28   : > { %v930_v61 = vcombine.low %v471_v41, %v485_v54  ;;  %v494_v63 = vrot.slane %v493_v50, 4  ;;  %967 = vmatprep.mubr.msk.bf16.mxu1 %vm213_vm6, %v898_v52  ;;  %v716_v1 = vrot.slane %v714_v51, 5  ;;  %v737_v12 = vsel %vm526_vm1, %v718_v60, 0  ;;  %996 = vmatpush3.bf16.msra.mxu0 %v629_v8 }
  0x29   : > { %v711_v0 = vor.u32 %v710_v55, %v707_v48  ;;  %968 = vmatmul.mubr.msk.bf16.vlgmr.msra.gmra.mrb[0].mxu1 %vm213_vm6, %v899_v53  ;;  %1053 = vmatprep.subr.msk.bf16.mxu0 %vm526_vm1, %v718_v60  ;;  %v901_v6 = vcombine.low %v1209_v14, %v188_v32  ;;  %v908_v18 = vcombine.low %v1172_v27, %v1185_v46 }
  0x2a   : > { %v499_v10 = vsel %vm1178_vm5, %v494_v63, %v498_v44  ;;  %971 = vmatprep.mubr.msk.bf16.mxu1 %vm213_vm6, %v900_v59  ;;  %976 = vmatpush3.bf16.msra.mxu1 %v1119_v2  ;;  %v906_v2 = vcombine.low %v1147_v7, %v1151_v9  ;;  %v909_v36 = vcombine.low %v1200_v58, %v1209_v14 }
  0x2b   : > { %v918_v13 = vcombine.low %v485_v54, %v499_v10  ;;  %v712_v15 = vrot.slane %v711_v0, 4  ;;  %1051 = vmatprep.subr.msk.bf16.mxu1 %vm526_vm1, %v1124_v3  ;;  %v907_v3 = vcombine.low %v1155_v11, %v1165_v17 }
  0x2d   : > { %v717_v5 = vsel %vm1178_vm5, %v712_v15, %v716_v1  ;;  %610 = vrot.lane.b32.xlu1 %v918_v13, %s1082_s26 }
  0x2e   : > { %v931_v16 = vcombine.low %v499_v10, %v717_v5 }
  0x31   : > { %972 = vmatmul.mubr.msk.bf16.gmra.mrb[4].mxu1 %vm213_vm6, %v901_v6 }
  0x32   : > { %977 = vmatprep.mubr.msk.bf16.mxu1 %vm307_vm7, %v906_v2 }
  0x39   : > { %978 = vmatmul.mubr.msk.bf16.vlgmr.msra.gmra.mrb[0].mxu1 %vm307_vm7, %v907_v3 }
  0x3a   : > { %981 = vmatprep.mubr.msk.bf16.mxu1 %vm307_vm7, %v908_v18  ;;  %1016 = vmatpush3.bf16.msra.mxu1 %v1132_v4 }
  0x41   : > { %982 = vmatmul.mubr.msk.bf16.gmra.mrb[4].mxu1 %vm307_vm7, %v909_v36 }
  0x42   : > { %991 = vmatprep.mubr.msk.bf16.mxu1 %vm513_vm4, %v917_v47 }
  0x4d   : > { %992 = vmatmul.mubr.msk.bf16.vlgmr.msra.gmra.mrb[4].mxu1 %vm513_vm4, %v918_v13 }
  0x91   : > { %v605_v7 = vpop.permute.xlu0 %604 }
  0x92   : > { %997 = vmatprep.mubr.msk.bf16.mxu0 %vm513_vm4, %v605_v7 }
  0x95   : > { %v607_v9 = vpop.permute.xlu0 %606 }
  0x96   : > { %998 = vmatmul.mubr.msk.bf16.vlgmr.msra.gmra.mrb[0].mxu0 %vm513_vm4, %v607_v9 }
  0x97   : > { %1006 = vmatpush3.bf16.msra.mxu0 %v737_v12 }
  0x99   : > { %v609_v11 = vpop.permute.xlu1 %608 }
  0x9a   : > { %1001 = vmatprep.mubr.msk.bf16.mxu0 %vm513_vm4, %v609_v11 }
  0x9f   : > { %v611_v4 = vpop.permute.xlu1 %610 }
  0xa0   : > { %1002 = vmatmul.mubr.msk.bf16.gmra.mrb[4].mxu0 %vm513_vm4, %v611_v4 }
  0xa1   : > { %1007 = vmatprep.mubr.msk.bf16.mxu0 %vm513_vm4, %v928_v62 }
  0xa8   : > { %1008 = vmatmul.mubr.msk.bf16.vlgmr.msra.gmra.mrb[0].mxu0 %vm513_vm4, %v929_v42 }
  0xa9   : > { %1011 = vmatprep.mubr.msk.bf16.mxu0 %vm513_vm4, %v930_v61 }
  0xb0   : > { %1012 = vmatmul.mubr.msk.bf16.gmra.mrb[4].mxu0 %vm513_vm4, %v931_v16 }
 0x10c   : > { %v979_v17 = vpop.f32.mrb[0].mxu1 }
 0x10d   : > { %v354_v27 = vpop.f32.mrb[1].mxu1 }
 0x10e   : > { %v980_v46 = vpop.f32.mrb[2].mxu1 }
 0x10f   : > { %v357_v58 = vpop.f32.mrb[3].mxu1 }
 0x120   : > { %v993_v14 = vpop.f32.mrb[4].mxu1 }
 0x121   : > { %v580_v19 = vpop.f32.mrb[5].mxu1 }
 0x122   : > { %v994_v20 = vpop.f32.mrb[6].mxu1 }
 0x123   : > { %v583_v21 = vpop.f32.mrb[7].mxu1 }
 0x17b   : > { %v1009_v22 = vpop.f32.mrb[0].mxu0 }
 0x17c   : > { %v1017_v57 = vadd.f32 %v1009_v22, %v979_v17  ;;  %v773_v62 = vpop.f32.mrb[1].mxu0 }
 0x17d   : > { %v1018_v23 = vadd.f32 %v773_v62, %v354_v27  ;;  %v1010_v24 = vpop.f32.mrb[2].mxu0 }
 0x17e   : > { %v821_v25 = vadd.f32 %v1017_v57, %v936_v56  ;;  %v1019_v26 = vadd.f32 %v1010_v24, %v980_v46  ;;  %v776_v28 = vpop.f32.mrb[3].mxu0 }
 0x17f   : > { %v819_v29 = vadd.f32 %v1018_v23, %v936_v56  ;;  %v1020_v30 = vadd.f32 %v776_v28, %v357_v58 }
 0x180   : > { %829 = vst.msk [vmem:[%s170_s7 + $0x10] sm:$0xff] %vm513_vm4, %v821_v25  ;;  %v822_v31 = vadd.f32 %v1019_v26, %v936_v56 }
 0x181   : > { %827 = vst.msk [vmem:[%s170_s7] sm:$0xff] %vm513_vm4, %v819_v29  ;;  %v820_v32 = vadd.f32 %v1020_v30, %v936_v56 }
 0x182   : > { %830 = vst.msk [vmem:[%s170_s7 + $0x18] sm:$0xff] %vm513_vm4, %v822_v31 }
 0x183   : > { %828 = vst.msk [vmem:[%s170_s7 + $0x8] sm:$0xff] %vm513_vm4, %v820_v32  ;;  %v1013_v33 = vpop.f32.mrb[4].mxu0 }
 0x184   : > { %v1021_v34 = vadd.f32 %v1013_v33, %v993_v14  ;;  %v789_v35 = vpop.f32.mrb[5].mxu0 }
 0x185   : > { %v1022_v37 = vadd.f32 %v789_v35, %v580_v19  ;;  %v1014_v38 = vpop.f32.mrb[6].mxu0 }
 0x186   : > { %v825_v39 = vadd.f32 %v1021_v34, %v936_v56  ;;  %v1023_v40 = vadd.f32 %v1014_v38, %v994_v20  ;;  %v792_v41 = vpop.f32.mrb[7].mxu0 }
 0x187   : > { %v823_v42 = vadd.f32 %v1022_v37, %v936_v56  ;;  %v1024_v43 = vadd.f32 %v792_v41, %v583_v21 }
 0x188   : > { %833 = vst.msk [vmem:[%s170_s7 + $0x30] sm:$0xff] %vm513_vm4, %v825_v39  ;;  %v826_v44 = vadd.f32 %v1023_v40, %v936_v56 }
 0x189   : > { %831 = vst.msk [vmem:[%s170_s7 + $0x20] sm:$0xff] %vm513_vm4, %v823_v42  ;;  %v824_v45 = vadd.f32 %v1024_v43, %v936_v56 }
 0x18a   : > { %834 = vst.msk [vmem:[%s170_s7 + $0x38] sm:$0xff] %vm513_vm4, %v826_v44 }
 0x18b   : > { %832 = vst.msk [vmem:[%s170_s7 + $0x28] sm:$0xff] %vm513_vm4, %v824_v45 }
 0x18c PF: > { %s13_s12 = sadd.s32 1, %s1080_s12  }
 0x18d   : > { %p10_p4 = scmp.ge.s32.totalorder %s13_s12, 4  }
 0x18f   :  { %12 = sbr.rel (!%p10_p4) target bundleno = 1 (0x1), region = 62 }

</bundles_post_ra>
